<compile_context>
chip_gen: v7x
topology: tpu7x:2x2x1
jax: 0.10.0
libtpu: 0.0.40
codegen_flags: <defaults>
</compile_context>

<pallas_src>
import jax
import jax.numpy as jnp
from jax import lax
from jax.experimental import pallas as pl
from jax.experimental.pallas import tpu as pltpu

ALPHA = 0.2     # LeakyReLU negative slope
EPS = 1e-15
LANE = 256      # edge-tile granularity (full MXU tile on v6e/v7x, 2x on v5e)


def _round_up(x, m):
    return ((x + m - 1) // m) * m


def _gat_edge_kernel(h_ref, s12_ref, src_ref, dst_ref, out_ref):
    """One edge-tile step of the sparse-GAT forward.

    h_ref   : (Np, Fp) bf16  resident [h = x@W | ones | pad], zero rows for pad nodes
    s12_ref : (Np, 2)  f32   resident per-node score terms [h@a1^T | h@a2^T]
    src_ref : (1, TE)  int32 edge source-node index for this tile (-1 = padding)
    dst_ref : (1, TE)  int32 edge destination-node index         (-1 = padding)
    out_ref : (Np, Fp) f32   resident partial accumulator for this edge split
    """
    @pl.when(pl.program_id(1) == 0)
    def _init():
        out_ref[...] = jnp.zeros_like(out_ref)

    np_, _ = h_ref.shape
    te = src_ref.shape[1]

    # Rebuild the one-hot masks in-register from the int32 indices.
    # Padded edges (index -1) give an all-zero column -> no contribution.
    node_ids = lax.broadcasted_iota(jnp.int32, (np_, te), dimension=0)
    src_eq = node_ids == src_ref[...]                           # (Np, TE) bool
    dst_eq = node_ids == dst_ref[...]                           # (Np, TE) bool

    # Destination gather: single native-bf16 MXU pass (f32 accumulate).
    #   g[k, :Fo] = h[dst_k]     g[k, Fo] = 1 for real edges (rowsum column)
    dst_oh = jnp.where(dst_eq, 1.0, 0.0).astype(jnp.bfloat16)   # exact 0/1
    g = lax.dot_general(dst_oh, h_ref[...],
                        dimension_numbers=(((0,), (0,)), ((), ())),
                        preferred_element_type=jnp.float32)     # (TE, Fp)

    # Per-edge attention score on the VPU/XLU (no MXU pass), f32:
    #   score_k = s1[src_k] + s2[dst_k]
    s1 = s12_ref[:, 0:1]                                        # (Np, 1) f32
    s2 = s12_ref[:, 1:2]                                        # (Np, 1) f32
    score = jnp.sum(jnp.where(src_eq, s1, 0.0) + jnp.where(dst_eq, s2, 0.0),
                    axis=0, keepdims=True)                      # (1, TE)
    lrelu = jnp.where(score > 0, score, ALPHA * score)
    edge_e = jnp.exp(-lrelu)                                    # (1, TE), EUP

    # Scatter-add over source nodes; edge_e is folded into the src operand so
    # the single bf16 MXU pass also produces the rowsum (ones column of g).
    # g is exactly bf16-representable (one-hot gather of bf16 h) -> lossless cast.
    src_scaled = jnp.where(src_eq, edge_e, 0.0).astype(jnp.bfloat16)   # (Np, TE)
    out_ref[...] += jnp.dot(src_scaled, g.astype(jnp.bfloat16),
                            preferred_element_type=jnp.float32)        # (Np, Fp)


def sp_graph_attention_layer(x, W, a, adj, *, edge_tile=None):
    """x: (N, F_in); W: (F_in, F_out); a: (1, 2*F_out);
    adj: (E, 2) int32 edge list (adj[:,0]=src, adj[:,1]=dst; module uses edge=adj.T)."""
    N, F_in = x.shape
    F_out = W.shape[1]
    E = adj.shape[0]

    Np = _round_up(N, 128)             # lane/sublane-aligned node axis
    Fp = _round_up(F_out + 1, 128)     # lane-dense output columns: h | rowsum-ones | pad

    # ---- generation-aware tiling / VMEM budget --------------------------------
    try:
        vmem_cap = int(pltpu.get_tpu_info().vmem_capacity_bytes)
    except Exception:                  # conservative fallback (v7x-sized)
        vmem_cap = 64 << 20
    small_vmem = vmem_cap <= (64 << 20)                  # v7x-class TensorCore
    temp_budget = (20 << 20) if small_vmem else (56 << 20)
    if edge_tile is None:
        # ~16 B per (Np, TE) element covers the mask / bf16 / f32 score temporaries.
        TE = (temp_budget // (16 * Np)) // LANE * LANE
        TE = max(LANE, min(TE, 1024 if small_vmem else 2048))
    else:
        TE = _round_up(max(int(edge_tile), LANE), LANE)
    TE = min(TE, _round_up(E, LANE))

    total_tiles = -(-E // TE)
    n_splits = 2 if total_tiles >= 2 else 1              # v7x: one edge half per TensorCore
    tiles_per_split = -(-total_tiles // n_splits)
    Ep = n_splits * tiles_per_split * TE

    # ---- node-side precompute in XLA (cheap; keeps in-kernel VMEM minimal) ----
    xf = x.astype(jnp.float32)
    Wf = W.astype(jnp.float32)
    af = a.astype(jnp.float32)
    h = xf @ Wf                                          # (N, Fo) f32
    s1 = h @ af[:, :F_out].T                             # (N, 1)  a1 . h
    s2 = h @ af[:, F_out:].T                             # (N, 1)  a2 . h

    h_aug = jnp.zeros((Np, Fp), jnp.float32)
    h_aug = h_aug.at[:N, :F_out].set(h)
    h_aug = h_aug.at[:N, F_out].set(1.0)                 # rowsum ones column
    h_aug = h_aug.astype(jnp.bfloat16)                   # bf16 operand for the MXU

    s12 = jnp.zeros((Np, 2), jnp.float32)
    s12 = s12.at[:N, 0].set(s1[:, 0])
    s12 = s12.at[:N, 1].set(s2[:, 0])

    # ---- edge index streams (int32 rows; padded edges = -1) -------------------
    src = adj[:, 0].astype(jnp.int32)
    dst = adj[:, 1].astype(jnp.int32)
    if Ep > E:
        pad = jnp.full((Ep - E,), -1, jnp.int32)
        src = jnp.concatenate([src, pad])
        dst = jnp.concatenate([dst, pad])
    src_idx = src.reshape(1, Ep)
    dst_idx = dst.reshape(1, Ep)

    # ---- scheduler / VMEM hints ------------------------------------------------
    flops = 4 * Ep * Np * Fp + 10 * Ep * Np              # 2 bf16 MXU passes + VPU mask work
    transcendentals = Ep                                 # exp per edge
    bytes_accessed = (Np * Fp * 2 + Np * 2 * 4 + 2 * Ep * 4
                      + n_splits * Np * Fp * 4)
    resident = 2 * (Np * Fp * 2 + Np * 2 * 4) + 2 * Np * Fp * 4
    temporaries = 16 * Np * TE + 2 * 2 * 8 * TE * 4      # (Np,TE) temps + idx tiles
    vmem_limit = int(min(max(32 << 20, 2 * (resident + temporaries)),
                         vmem_cap - (8 << 20)))

    partials = pl.pallas_call(
        _gat_edge_kernel,
        out_shape=jax.ShapeDtypeStruct((n_splits, Np, Fp), jnp.float32),
        grid_spec=pltpu.PrefetchScalarGridSpec(
            num_scalar_prefetch=0,
            grid=(n_splits, tiles_per_split),
            in_specs=[
                pl.BlockSpec((Np, Fp), lambda c, e: (0, 0)),     # h_aug (resident)
                pl.BlockSpec((Np, 2), lambda c, e: (0, 0)),      # s1|s2 (resident)
                pl.BlockSpec((1, TE),                            # src index tile
                             lambda c, e: (0, c * tiles_per_split + e)),
                pl.BlockSpec((1, TE),                            # dst index tile
                             lambda c, e: (0, c * tiles_per_split + e)),
            ],
            out_specs=pl.BlockSpec((None, Np, Fp), lambda c, e: (c, 0, 0)),
        ),
        compiler_params=pltpu.CompilerParams(
            dimension_semantics=("parallel", "arbitrary"),
            vmem_limit_bytes=vmem_limit,
        ),
        cost_estimate=pl.CostEstimate(flops=flops,
                                      transcendentals=transcendentals,
                                      bytes_accessed=bytes_accessed),
    )(h_aug, s12, src_idx, dst_idx)

    # ---- epilogue in XLA: cross-split sum, rowsum-normalize, ELU ---------------
    acc = jnp.sum(partials, axis=0)[:N]                  # (N, Fp)
    rowsum = acc[:, F_out:F_out + 1] + EPS               # fused via the ones column
    h_prime = acc[:, :F_out] / rowsum
    # TODO(synk): for very large sparse graphs (N >= ~10k) the dense Np-wide
    # contraction gets wasteful; switch to node-blocked tiles with
    # scalar-prefetched, src-sorted edge ranges.
    return jnp.where(h_prime > 0, h_prime, jnp.exp(h_prime) - 1.0)   # ELU (concat=True)


def _reference(x, W, a, adj):
    """Pure-JAX fp32 reference mirroring the PyTorch forward."""
    N = x.shape[0]
    F_out = W.shape[1]
    src, dst = adj[:, 0], adj[:, 1]
    h = x @ W
    edge_h = jnp.concatenate([h[src], h[dst]], axis=1)          # (E, 2Fo)
    scores = edge_h @ a.T                                       # (E, 1)
    lrelu = jnp.where(scores > 0, scores, ALPHA * scores)
    edge_e = jnp.exp(-lrelu)[:, 0]                              # (E,)
    e_rowsum = jnp.zeros((N, 1)).at[src, 0].add(edge_e) + EPS
    h_prime = jnp.zeros((N, F_out)).at[src].add(edge_e[:, None] * h[dst])
    h_prime = h_prime / e_rowsum
    return jnp.where(h_prime > 0, h_prime, jnp.exp(h_prime) - 1.0)


if __name__ == "__main__":
    N, F_in, F_out = 64, 16, 32

    key = jax.random.PRNGKey(0)
    kx, kw, ka = jax.random.split(key, 3)

    # deterministic parameter init (xavier_normal_ shapes from __init__)
    w_std = (2.0 / (F_in + F_out)) ** 0.5
    a_std = (2.0 / (1 + 2 * F_out)) ** 0.5
    W = w_std * jax.random.normal(kw, (F_in, F_out), dtype=jnp.float32)
    a = a_std * jax.random.normal(ka, (1, 2 * F_out), dtype=jnp.float32)
    x = jax.random.normal(kx, (N, F_in), dtype=jnp.float32)

    # fully-connected edge list -> E = N*N = 4096 edges; with edge_tile=256 the
    # kernel runs a (2 split x 8 tile) grid, exercising both the resident
    # accumulator loop and the cross-split partial sum.
    ii, jj = jnp.meshgrid(jnp.arange(N, dtype=jnp.int32),
                          jnp.arange(N, dtype=jnp.int32), indexing="ij")
    adj = jnp.stack([ii.reshape(-1), jj.reshape(-1)], axis=1)       # (4096, 2)

    out = sp_graph_attention_layer(x, W, a, adj, edge_tile=256)
    out = jax.block_until_ready(out)

    ref = _reference(x, W, a, adj)
    assert out.shape == (N, F_out)
    # bf16 MXU operands (h, edge_e) with f32 accumulation -> relaxed fp32 tolerance.
    assert jnp.allclose(out, ref, atol=2e-2, rtol=2e-2), "mismatch vs reference"

    print("KERNEL_OK")
</pallas_src>

<mosaic_0001>
module attributes {stable_mosaic.version = 11 : i64} {
  func.func @_gat_edge_kernel(%arg0: i32, %arg1: i32, %arg2: memref<128x128xbf16, #tpu.memory_space<vmem>>, %arg3: memref<128x2xf32, #tpu.memory_space<vmem>>, %arg4: memref<1x256xi32, #tpu.memory_space<vmem>>, %arg5: memref<1x256xi32, #tpu.memory_space<vmem>>, %arg6: memref<1x128x128xf32, #tpu.memory_space<vmem>>) attributes {dimension_semantics = [#tpu.dimension_semantics<parallel>, #tpu.dimension_semantics<arbitrary>], iteration_bounds = array<i64: 2, 8>, scalar_prefetch = 0 : i64, scratch_operands = 0 : i64, tpu.core_type = #tpu.core_type<tc>, window_params = [{pipeline_mode = #tpu.pipeline_mode<synchronous>, transform_indices = @transform_0, window_bounds = array<i64: 128, 128>}, {pipeline_mode = #tpu.pipeline_mode<synchronous>, transform_indices = @transform_1, window_bounds = array<i64: 128, 2>}, {transform_indices = @transform_2, window_bounds = array<i64: 1, 256>}, {transform_indices = @transform_3, window_bounds = array<i64: 1, 256>}, {transform_indices = @transform_4, window_bounds = array<i64: 1, 128, 128>}]} {
    %c0_i32 = arith.constant 0 : i32
    %0 = arith.cmpi eq, %arg1, %c0_i32 : i32
    %1 = arith.extui %0 : i1 to i32
    %c0_i32_0 = arith.constant 0 : i32
    %2 = arith.cmpi ne, %1, %c0_i32_0 : i32
    scf.if %2 {
      %cst_25 = arith.constant 0.000000e+00 : f32
      %50 = vector.broadcast %cst_25 : f32 to vector<128x128xf32>
      %c0_26 = arith.constant 0 : index
      %c0_27 = arith.constant 0 : index
      %c0_28 = arith.constant 0 : index
      %51 = vector.load %arg6[%c0_26, %c0_27, %c0_28] : memref<1x128x128xf32, #tpu.memory_space<vmem>>, vector<1x128x128xf32>
      %52 = vector.shape_cast %51 : vector<1x128x128xf32> to vector<128x128xf32>
      %53 = vector.shape_cast %50 : vector<128x128xf32> to vector<1x128x128xf32>
      tpu.vector_store %arg6[%c0_26, %c0_27, %c0_28], %53 {strides = array<i32>} : memref<1x128x128xf32, #tpu.memory_space<vmem>>, vector<1x128x128xf32>,
    } else {
    }
    %3 = tpu.iota {dimensions = array<i32: 0>} : vector<128x256xi32>
    %c0 = arith.constant 0 : index
    %c0_1 = arith.constant 0 : index
    %4 = vector.load %arg4[%c0, %c0_1] : memref<1x256xi32, #tpu.memory_space<vmem>>, vector<1x256xi32>
    %5 = vector.broadcast %4 : vector<1x256xi32> to vector<128x256xi32>
    %6 = arith.cmpi eq, %3, %5 : vector<128x256xi32>
    %c0_2 = arith.constant 0 : index
    %c0_3 = arith.constant 0 : index
    %7 = vector.load %arg5[%c0_2, %c0_3] : memref<1x256xi32, #tpu.memory_space<vmem>>, vector<1x256xi32>
    %8 = vector.broadcast %7 : vector<1x256xi32> to vector<128x256xi32>
    %9 = arith.cmpi eq, %3, %8 : vector<128x256xi32>
    %cst = arith.constant 1.000000e+00 : f32
    %cst_4 = arith.constant 0.000000e+00 : f32
    %10 = vector.broadcast %cst : f32 to vector<128x256xf32>
    %11 = vector.broadcast %cst_4 : f32 to vector<128x256xf32>
    %12 = arith.select %9, %10, %11 : vector<128x256xi1>, vector<128x256xf32>
    %13 = arith.truncf %12 : vector<128x256xf32> to vector<128x256xbf16>
    %c0_5 = arith.constant 0 : index
    %c0_6 = arith.constant 0 : index
    %14 = vector.load %arg2[%c0_5, %c0_6] : memref<128x128xbf16, #tpu.memory_space<vmem>>, vector<128x128xbf16>
    %cst_7 = arith.constant dense<0.000000e+00> : vector<256x128xf32>
    %15 = tpu.matmul %13, %14, %cst_7 {dimension_numbers = #tpu.dot_dimension_numbers<[0], [0], [1], [1], [0, 1, 1, 1], [], []>} : vector<128x256xbf16>, vector<128x128xbf16>, vector<256x128xf32> -> vector<256x128xf32>
    %c0_8 = arith.constant 0 : index
    %c0_9 = arith.constant 0 : index
    %16 = vector.load %arg3[%c0_8, %c0_9] : memref<128x2xf32, #tpu.memory_space<vmem>>, vector<128x1xf32>
    %c0_10 = arith.constant 0 : index
    %c1 = arith.constant 1 : index
    %17 = vector.load %arg3[%c0_10, %c1] : memref<128x2xf32, #tpu.memory_space<vmem>>, vector<128x1xf32>
    %cst_11 = arith.constant 0.000000e+00 : f32
    %18 = vector.shape_cast %16 : vector<128x1xf32> to vector<128x1xf32>
    %19 = vector.broadcast %18 : vector<128x1xf32> to vector<128x256xf32>
    %20 = vector.broadcast %cst_11 : f32 to vector<128x256xf32>
    %21 = arith.select %6, %19, %20 : vector<128x256xi1>, vector<128x256xf32>
    %cst_12 = arith.constant 0.000000e+00 : f32
    %22 = vector.shape_cast %17 : vector<128x1xf32> to vector<128x1xf32>
    %23 = vector.broadcast %22 : vector<128x1xf32> to vector<128x256xf32>
    %24 = vector.broadcast %cst_12 : f32 to vector<128x256xf32>
    %25 = arith.select %9, %23, %24 : vector<128x256xi1>, vector<128x256xf32>
    %26 = arith.addf %21, %25 : vector<128x256xf32>
    %cst_13 = arith.constant dense<0.000000e+00> : vector<256xf32>
    %27 = vector.multi_reduction <add>, %26, %cst_13 [0] : vector<128x256xf32> to vector<256xf32>
    %28 = vector.shape_cast %27 : vector<256xf32> to vector<1x256xf32>
    %cst_14 = arith.constant 0.000000e+00 : f32
    %29 = vector.broadcast %cst_14 : f32 to vector<1x256xf32>
    %30 = arith.cmpf ogt, %28, %29 : vector<1x256xf32>
    %cst_15 = arith.constant 2.000000e-01 : f32
    %31 = vector.broadcast %cst_15 : f32 to vector<1x256xf32>
    %32 = arith.mulf %31, %28 : vector<1x256xf32>
    %33 = arith.select %30, %28, %32 : vector<1x256xi1>, vector<1x256xf32>
    %cst_16 = arith.constant 0.000000e+00 : f32
    %34 = vector.broadcast %cst_16 : f32 to vector<1x256xf32>
    %35 = arith.subf %34, %33 : vector<1x256xf32>
    %36 = math.exp %35 : vector<1x256xf32>
    %cst_17 = arith.constant 0.000000e+00 : f32
    %37 = vector.shape_cast %36 : vector<1x256xf32> to vector<1x256xf32>
    %38 = vector.broadcast %37 : vector<1x256xf32> to vector<128x256xf32>
    %39 = vector.broadcast %cst_17 : f32 to vector<128x256xf32>
    %40 = arith.select %6, %38, %39 : vector<128x256xi1>, vector<128x256xf32>
    %41 = arith.truncf %40 : vector<128x256xf32> to vector<128x256xbf16>
    %c0_18 = arith.constant 0 : index
    %c0_19 = arith.constant 0 : index
    %c0_20 = arith.constant 0 : index
    %42 = vector.load %arg6[%c0_18, %c0_19, %c0_20] : memref<1x128x128xf32, #tpu.memory_space<vmem>>, vector<1x128x128xf32>
    %43 = vector.shape_cast %42 : vector<1x128x128xf32> to vector<128x128xf32>
    %44 = arith.truncf %15 : vector<256x128xf32> to vector<256x128xbf16>
    %cst_21 = arith.constant dense<0.000000e+00> : vector<128x128xf32>
    %45 = tpu.matmul %41, %44, %cst_21 {dimension_numbers = #tpu.dot_dimension_numbers<[1], [0], [0], [1], [0, 0, 1, 1], [], []>} : vector<128x256xbf16>, vector<256x128xbf16>, vector<128x128xf32> -> vector<128x128xf32>
    %46 = arith.addf %43, %45 : vector<128x128xf32>
    %c0_22 = arith.constant 0 : index
    %c0_23 = arith.constant 0 : index
    %c0_24 = arith.constant 0 : index
    %47 = vector.load %arg6[%c0_22, %c0_23, %c0_24] : memref<1x128x128xf32, #tpu.memory_space<vmem>>, vector<1x128x128xf32>
    %48 = vector.shape_cast %47 : vector<1x128x128xf32> to vector<128x128xf32>
    %49 = vector.shape_cast %46 : vector<128x128xf32> to vector<1x128x128xf32>
    tpu.vector_store %arg6[%c0_22, %c0_23, %c0_24], %49 {strides = array<i32>} : memref<1x128x128xf32, #tpu.memory_space<vmem>>, vector<1x128x128xf32>,
    return
  }
  func.func @transform_0(%arg0: i32, %arg1: i32) -> (i32, i32) {
    %c0_i32 = arith.constant 0 : i32
    %c0_i32_0 = arith.constant 0 : i32
    %c0_i32_1 = arith.constant 0 : i32
    return %c0_i32, %c0_i32_0 : i32, i32
  }
  func.func @transform_1(%arg0: i32, %arg1: i32) -> (i32, i32) {
    %c0_i32 = arith.constant 0 : i32
    %c0_i32_0 = arith.constant 0 : i32
    %c0_i32_1 = arith.constant 0 : i32
    return %c0_i32, %c0_i32_0 : i32, i32
  }
  func.func @transform_2(%arg0: i32, %arg1: i32) -> (i32, i32) {
    %c8_i32 = arith.constant 8 : i32
    %0 = arith.muli %arg0, %c8_i32 : i32
    %1 = arith.addi %0, %arg1 : i32
    %c0_i32 = arith.constant 0 : i32
    %c0_i32_0 = arith.constant 0 : i32
    return %c0_i32, %1 : i32, i32
  }
  func.func @transform_3(%arg0: i32, %arg1: i32) -> (i32, i32) {
    %c8_i32 = arith.constant 8 : i32
    %0 = arith.muli %arg0, %c8_i32 : i32
    %1 = arith.addi %0, %arg1 : i32
    %c0_i32 = arith.constant 0 : i32
    %c0_i32_0 = arith.constant 0 : i32
    return %c0_i32, %1 : i32, i32
  }
  func.func @transform_4(%arg0: i32, %arg1: i32) -> (i32, i32, i32) {
    %c0_i32 = arith.constant 0 : i32
    %c0_i32_0 = arith.constant 0 : i32
    %c0_i32_1 = arith.constant 0 : i32
    return %arg0, %c0_i32, %c0_i32_0 : i32, i32, i32
  }
}

</mosaic_0001>

<bundles_post_ra>
// kernel: tpu_custom_call.1
= control target key start
LH: loop header
LB: loop body
LE: loop exit
PB: predicated region body
PF: predicated region fallthrough
CT: control target
= control target key end

     0   :  { %9 = vsyncpa [#allocation3], 0  ;;  %s2635_s0 = inlined_call_operand.vmem [shape: bf16[128,128], index: 0, kind: input, shape index: {}]   ;;  %s2636_s1 = inlined_call_operand.vmem [shape: f32[128,2], index: 1, kind: input, shape index: {}]   ;;  %s2637_s2 = inlined_call_operand.vmem [shape: s32[1,4096], index: 2, kind: input, shape index: {}]   ;;  %s2638_s3 = inlined_call_operand.vmem [shape: s32[1,4096], index: 3, kind: input, shape index: {}]   ;;  %s2639_s4 = inlined_call_operand.hbm [shape: f32[2,128,128], index: 4, kind: output, shape index: {}]  }
   0x1   :  { %11 = vsyncpa [#allocation3 + $0x1], 0  ;;  %s1725_s15 = smov 0   ;;  %s1727_s16 = smov 0  }
   0x2   :  { %s1729_s17 = smov 0   ;;  %s1731_s18 = smov 0  }
   0x3   :  { %s1733_s19 = smov 0   ;;  %s1735_s20 = smov 0  }
   0x4   :  { %s1737_s21 = smov 0   ;;  %s1739_s22 = smov 0  }
   0x5 LB: > { %s1291_s23 = sadd.s32 4294967295, %s1691_s22   ;;  %s1292_s24 = sadd.s32 4294967294, %s1691_s22   ;;  %s1691_s22 = sphi %s1739_s22, %s17_s22   ;;  %s1687_s21 = sphi %s1737_s21, %s2730_s21   ;;  %s1683_s20 = sphi %s1735_s20, %s2729_s20   ;;  %s1679_s19 = sphi %s1733_s19, %s2728_s19   ;;  %s1675_s18 = sphi %s1731_s18, %s2727_s18   ;;  %s1671_s17 = sphi %s1729_s17, %s2726_s17   ;;  %s1667_s16 = sphi %s1727_s16, %s2725_s16   ;;  %s1663_s15 = sphi %s1725_s15, %s2724_s15  }
   0x6   : > { %s26_s25 = sadd.s32 1, %s1683_s20  ;;  %s29_s26 = sadd.s32 1, %s1687_s21 }
   0x7   : > { %p27_p0 = scmp.ge.s32.totalorder %s26_s25, 8  ;;  %p148_p1 = scmp.ne.s32.totalorder %s1671_s17, %s1667_s16 }
   0x8   : > { %p149_p2 = scmp.eq.s32.totalorder %s1291_s23, 15  ;;  %p154_p4 = scmp.ne.s32.totalorder %s1667_s16, %s1663_s15 }
   0x9   : > { %s2732_s25 = smov (%p27_p0, %s26_s25), 0  ;;  %s2734_s26 = smov (!%p27_p0, %s29_s26), %s1687_s21 }
   0xa   : > { %p1774_p3 = por %p149_p2, %p148_p1  ;;  %p31_p5 = scmp.ge.s32.totalorder %s2734_s26, 2 }
   0xb   : > { %p155_p6 = scmp.eq.s32.totalorder %s1292_s24, 15  ;;  %p1299_p7 = scmp.ge.s32.totalorder %s1691_s22, 1 }
   0xc   : > { %p203_p8 = scmp.lt.s32.totalorder %s1691_s22, 17  ;;  %s2736_s26 = smov (%p31_p5, %s2734_s26), 0 }
   0xd   : > { %p1784_p9 = por %p155_p6, %p154_p4  ;;  %s135_s29 = ssub.s32 %s1687_s21, %s2736_s26 }
   0xe   : > { %p204_p10 = pnand %p1299_p7, %p203_p8  ;;  %s138_s30 = sadd.s32 1, %s1671_s17 }
   0xf   : > { %p136_p11 = scmp.eq.s32.totalorder %s135_s29, 0  ;;  %s233_s6 = sand.u32 (!%p204_p10), 1, %s1667_s16  }
  0x10   : > { %207 = sbr.rel (%p204_p10) target bundleno = 723 (0x2d3), region = 36  ;;  %s1301_s7 = sshll.u32 (!%p204_p10), %s1679_s19, 3 }
  0x11   : > { %s1792_s5 = scalar_select %p136_p11, %s1671_s17, %s138_s30  }
  0x12   : > { %s1300_s8 = sshll.u32 (!%p204_p10), %s233_s6, 7  ;;  %s237_s9 = sadd.s32 (!%p204_p10), %s1675_s18, %s1301_s7 }
  0x13   : > { %s1302_s10 = sshll.u32 (!%p204_p10), %s237_s9, 1  ;;  %s1809_s29 = scalar_lea.vmem (!%p204_p10), [#allocation2], %s1300_s8 }
  0x14   : > { %p239_p12 = scmp.lt.s32.totalorder (!%p204_p10), %s1302_s10, 31  ;;  %p1305_p13 = scmp.ne.s32.totalorder (!%p204_p10), %s1675_s18, 0 }
  0x17   : > { %s2738_s10 = smov (!%p239_p12, %s1302_s10), 31  ;;  %258 = sbr.rel (%p1305_p13) target bundleno = 33 (0x21), region = 40 }
  0x18   : > { %s241_s13 = scalar_lea.vmem %s2637_s2, %s2738_s10  ;;  %s250_s24 = scalar_lea.vmem %s2638_s3, %s2738_s10  ;;  %v1693_v0 = vmov (!%p1305_p13), 0.0  }
  0x19   : > { %259 = vst [vmem:[%s1809_s29] sm:$0xff] (!%p1305_p13), %v1693_v0  ;;  %260 = vst [vmem:[%s1809_s29 + $0x8] sm:$0xff] (!%p1305_p13), %v1693_v0 }
  0x1a   : > { %261 = vst [vmem:[%s1809_s29 + $0x10] sm:$0xff] (!%p1305_p13), %v1693_v0  ;;  %262 = vst [vmem:[%s1809_s29 + $0x18] sm:$0xff] (!%p1305_p13), %v1693_v0 }
  0x1b   : > { %263 = vst [vmem:[%s1809_s29 + $0x20] sm:$0xff] (!%p1305_p13), %v1693_v0  ;;  %264 = vst [vmem:[%s1809_s29 + $0x28] sm:$0xff] (!%p1305_p13), %v1693_v0 }
  0x1c   : > { %265 = vst [vmem:[%s1809_s29 + $0x30] sm:$0xff] (!%p1305_p13), %v1693_v0  ;;  %266 = vst [vmem:[%s1809_s29 + $0x38] sm:$0xff] (!%p1305_p13), %v1693_v0 }
  0x1d   : > { %267 = vst [vmem:[%s1809_s29 + $0x40] sm:$0xff] (!%p1305_p13), %v1693_v0  ;;  %268 = vst [vmem:[%s1809_s29 + $0x48] sm:$0xff] (!%p1305_p13), %v1693_v0 }
  0x1e   : > { %269 = vst [vmem:[%s1809_s29 + $0x50] sm:$0xff] %v1693_v0  ;;  %270 = vst [vmem:[%s1809_s29 + $0x58] sm:$0xff] %v1693_v0 }
  0x1f   : > { %271 = vst [vmem:[%s1809_s29 + $0x60] sm:$0xff] %v1693_v0  ;;  %272 = vst [vmem:[%s1809_s29 + $0x68] sm:$0xff] %v1693_v0 }
  0x20   : > { %273 = vst [vmem:[%s1809_s29 + $0x70] sm:$0xff] %v1693_v0  ;;  %274 = vst [vmem:[%s1809_s29 + $0x78] sm:$0xff] %v1693_v0 }
  0x21 PF: > { %v275_v1 = vlaneseq  ;;  %v1585_v2 = vld [vmem:[%s2635_s0] sm:$0xff]   ;;  %v1586_v4 = vld [vmem:[%s2635_s0 + $0x8] sm:$0xff]   ;;  %v1587_v10 = vld [vmem:[%s2635_s0 + $0x10] sm:$0xff]   ;;  %v1694_v17 = vmov 0.0   ;;  %s1367_s9 = sshll.u32 %s1679_s19, 11  ;;  %s1212_s11 = sshll.u32 %s1809_s29, 4  ;;  %s2577_s11 = int_to_ptr.vmem [resolvable:$true] %s1212_s11 }
  0x22   : > { %1456 = vmatprep.subr.bf16.mxu0 %v1585_v2  ;;  %v333_v5 = vld [vmem:[%s250_s24] sm:$0x3]  ;;  %v1588_v16 = vld [vmem:[%s2635_s0 + $0x18] sm:$0xff]   ;;  %v1590_v34 = vld [vmem:[%s2635_s0 + $0x28] sm:$0xff]   ;;  %s2575_s23 = scalar_lea.hbm %s2639_s4, %s1367_s9  ;;  %s2583_s19 = scalar_lea.sflag [#allocation3], %s233_s6 }
  0x23   : > { %v1831_v3 = vshrl.u32 %v275_v1, 7  ;;  %1457 = vmatpush3.bf16.msra.mxu0 %v1585_v2  ;;  %v1589_v26 = vld [vmem:[%s2635_s0 + $0x20] sm:$0xff]   ;;  %v1591_v42 = vld [vmem:[%s2635_s0 + $0x30] sm:$0xff]   ;;  %v1592_v50 = vld [vmem:[%s2635_s0 + $0x38] sm:$0xff]   ;;  %s1597_s24 = scalar_lea.vmem %s2577_s11, 2048  ;;  %s1697_s18 = smov [#allocation2]  }
  0x24   : > { %1458 = vmatprep.subr.bf16.mxu0 %v1586_v4  ;;  %p1598_p0 = scmp.ne.s32.totalorder %s2577_s11, %s1597_s24  ;;  %s1601_s30 = sshll.u32 %s1697_s18, 4  ;;  %s1602_s30 = int_to_ptr.vmem [resolvable:$false] %s1601_s30 }
  0x25   : > { %v1837_v6 = vadd.s32 8, %v1831_v3  ;;  %v295_v7 = vsub.s32 0, %v1831_v3  ;;  %v1841_v8 = vadd.s32 16, %v1831_v3  ;;  %v1844_v9 = vadd.s32 24, %v1831_v3  ;;  %s1603_s10 = scalar_lea.vmem %s1602_s30, 4096  ;;  %p1604_p4 = scmp.lt.s32.totalorder %s2577_s11, %s1602_s30 }
  0x26   : > { %v1854_v12 = vadd.s32 32, %v1831_v3  ;;  %v1857_v13 = vadd.s32 40, %v1831_v3  ;;  %v1860_v14 = vadd.s32 48, %v1831_v3  ;;  %v1863_v15 = vadd.s32 56, %v1831_v3  ;;  %p1599_p1 = pnand %p1598_p0, %p1774_p3  ;;  %p1605_p5 = scmp.lt.s32.totalorder %s1603_s10, %s1597_s24 }
  0x27   : > { %v1851_v11 = vrot.slane %v333_v5, %v295_v7  ;;  %1459 = vmatpush3.bf16.msra.mxu0 %v1586_v4  ;;  %v1897_v24 = vadd.s32 64, %v1831_v3  ;;  %v1900_v25 = vadd.s32 72, %v1831_v3  ;;  %v1918_v29 = vadd.s32 80, %v1831_v3 }
  0x28   : > { %1460 = vmatprep.subr.bf16.mxu0 %v1587_v10  ;;  %v1929_v33 = vadd.s32 88, %v1831_v3  ;;  %v299_v35 = vsub.s32 1, %v1831_v3  ;;  %v1940_v37 = vadd.s32 96, %v1831_v3  ;;  %v1943_v38 = vadd.s32 104, %v1831_v3  ;;  %p1600_p2 = pneg %p1599_p1  ;;  %p1606_p6 = por %p1605_p5, %p1604_p4 }
  0x29   : > { %vm342_vm0 = vcmp.eq.s32.totalorder %v1831_v3, %v1851_v11  ;;  %vm344_vm1 = vcmp.eq.s32.totalorder %v1837_v6, %v1851_v11  ;;  %vm346_vm2 = vcmp.eq.s32.totalorder %v1841_v8, %v1851_v11  ;;  %vm348_vm3 = vcmp.eq.s32.totalorder %v1844_v9, %v1851_v11 }
  0x2a   : > { %v374_v18 = vsel %vm342_vm0, 1.0, %v1694_v17  ;;  %v376_v19 = vsel %vm344_vm1, 1.0, %v1694_v17  ;;  %v378_v20 = vsel %vm346_vm2, 1.0, %v1694_v17  ;;  %v380_v21 = vsel %vm348_vm3, 1.0, %v1694_v17  ;;  %p1607_p7 = pnand %p1606_p6, %p1600_p2 }
  0x2b   : > { %v406_v22 = vpack.c.bf16 %v376_v19, %v374_v18  ;;  %vm350_vm4 = vcmp.eq.s32.totalorder %v1854_v12, %v1851_v11  ;;  %vm2647_vm5 = vcmp.eq.s32.totalorder %v1857_v13, %v1851_v11  ;;  %1461 = vmatpush3.bf16.msra.mxu0 %v1587_v10  ;;  %v408_v23 = vpack.c.bf16 %v380_v21, %v378_v20 }
  0x2c   : > { %1462 = vmatprep.subr.bf16.mxu0 %v1588_v16  ;;  %v382_v27 = vsel %vm350_vm4, 1.0, %v1694_v17  ;;  %v384_v28 = vsel %vm2647_vm5, 1.0, %v1694_v17  ;;  %vm2643_vm6 = vcmp.eq.s32.totalorder %v1860_v14, %v1851_v11  ;;  %vm2642_vm7 = vcmp.eq.s32.totalorder %v1863_v15, %v1851_v11 }
  0x2d   : > { %438 = vxpose.xlu0.c.b16.start [1/8] %v406_v22, 128  ;;  %v410_v30 = vpack.c.bf16 %v384_v28, %v382_v27  ;;  %v386_v31 = vsel %vm2643_vm6, 1.0, %v1694_v17  ;;  %v388_v32 = vsel %vm2642_vm7, 1.0, %v1694_v17  ;;  %vm2641_vm8 = vcmp.eq.s32.totalorder %v1897_v24, %v1851_v11  ;;  %v2106_v28 = vld [vmem:[%s241_s13] sm:$0x3] }
  0x2e   : > { %vm2640_vm9 = vcmp.eq.s32.totalorder %v1900_v25, %v1851_v11  ;;  %v412_v36 = vpack.c.bf16 %v388_v32, %v386_v31  ;;  %v1947_v39 = vrot.slane %v333_v5, %v299_v35  ;;  %v390_v40 = vsel %vm2641_vm8, 1.0, %v1694_v17  ;;  %v679_v32 = vld [vmem:[%s2636_s1] sm:$0xff] }
  0x2f   : > { %1463 = vmatpush3.bf16.msra.mxu0 %v1588_v16  ;;  %v392_v41 = vsel %vm2640_vm9, 1.0, %v1694_v17  ;;  %vm2645_vm10 = vcmp.eq.s32.totalorder %v1918_v29, %v1851_v11  ;;  %vm2644_vm11 = vcmp.eq.s32.totalorder %v1929_v33, %v1851_v11  ;;  %v1993_v49 = vadd.s32 112, %v1831_v3 }
  0x30   : > { %1464 = vmatprep.subr.bf16.mxu0 %v1589_v26  ;;  %vm343_vm12 = vcmp.eq.s32.totalorder %v1831_v3, %v1947_v39  ;;  %vm345_vm13 = vcmp.eq.s32.totalorder %v1837_v6, %v1947_v39  ;;  %vm347_vm14 = vcmp.eq.s32.totalorder %v1841_v8, %v1947_v39  ;;  %vm349_vm15 = vcmp.eq.s32.totalorder %v1844_v9, %v1947_v39 }
  0x31   : > { %439 = vxpose.xlu0.c.b16.cont [2/8] %v408_v23, 128  ;;  %v375_v43 = vsel %vm343_vm12, 1.0, %v1694_v17  ;;  %v377_v44 = vsel %vm345_vm13, 1.0, %v1694_v17  ;;  %v379_v45 = vsel %vm347_vm14, 1.0, %v1694_v17  ;;  %v381_v46 = vsel %vm349_vm15, 1.0, %v1694_v17 }
  0x32   : > { %v407_v47 = vpack.c.bf16 %v377_v44, %v375_v43  ;;  %vm351_vm9 = vcmp.eq.s32.totalorder %v1854_v12, %v1947_v39  ;;  %vm2646_vm8 = vcmp.eq.s32.totalorder %v1857_v13, %v1947_v39  ;;  %v414_v48 = vpack.c.bf16 %v392_v41, %v390_v40  ;;  %v683_v40 = vld [vmem:[%s2636_s1 + $0x20] sm:$0xff]  ;;  %v685_v43 = vld [vmem:[%s2636_s1 + $0x30] sm:$0xff]  ;;  %v686_v44 = vld [vmem:[%s2636_s1 + $0x38] sm:$0xff] }
  0x33   : > { %1465 = vmatpush3.bf16.msra.mxu0 %v1589_v26  ;;  %v394_v51 = vsel %vm2645_vm10, 1.0, %v1694_v17  ;;  %v396_v52 = vsel %vm2644_vm11, 1.0, %v1694_v17  ;;  %vm2649_vm7 = vcmp.eq.s32.totalorder %v1940_v37, %v1851_v11  ;;  %v409_v53 = vpack.c.bf16 %v381_v46, %v379_v45  ;;  %v687_v45 = vld [vmem:[%s2636_s1 + $0x40] sm:$0xff]  ;;  %v688_v46 = vld [vmem:[%s2636_s1 + $0x48] sm:$0xff] }
  0x34   : > { %1466 = vmatprep.subr.bf16.mxu0 %v1590_v34  ;;  %454 = vxpose.xlu1.c.b16.start [1/8] %v407_v47, 128  ;;  %vm2648_vm6 = vcmp.eq.s32.totalorder %v1943_v38, %v1851_v11  ;;  %v2011_v54 = vadd.s32 120, %v1831_v3  ;;  %v383_v55 = vsel %vm351_vm9, 1.0, %v1694_v17  ;;  %v385_v56 = vsel %vm2646_vm8, 1.0, %v1694_v17  ;;  %v689_v47 = vld [vmem:[%s2636_s1 + $0x50] sm:$0xff] }
  0x35   : > { %440 = vxpose.xlu0.c.b16.cont [3/8] %v410_v30, 128  ;;  %vm355_vm11 = vcmp.eq.s32.totalorder %v1860_v14, %v1947_v39  ;;  %vm2651_vm10 = vcmp.eq.s32.totalorder %v1863_v15, %v1947_v39  ;;  %v416_v57 = vpack.c.bf16 %v396_v52, %v394_v51  ;;  %v398_v58 = vsel %vm2649_vm7, 1.0, %v1694_v17  ;;  %v692_v51 = vld [vmem:[%s2636_s1 + $0x68] sm:$0xff]  ;;  %v693_v52 = vld [vmem:[%s2636_s1 + $0x70] sm:$0xff] }
  0x36   : > { %v400_v59 = vsel %vm2648_vm6, 1.0, %v1694_v17  ;;  %v411_v60 = vpack.c.bf16 %v385_v56, %v383_v55  ;;  %vm2650_vm8 = vcmp.eq.s32.totalorder %v1993_v49, %v1851_v11  ;;  %vm2652_vm5 = vcmp.eq.s32.totalorder %v2011_v54, %v1851_v11 }
  0x37   : > { %1467 = vmatpush3.bf16.msra.mxu0 %v1590_v34  ;;  %v387_v61 = vsel %vm355_vm11, 1.0, %v1694_v17  ;;  %v389_v62 = vsel %vm2651_vm10, 1.0, %v1694_v17  ;;  %vm359_vm6 = vcmp.eq.s32.totalorder %v1897_v24, %v1947_v39  ;;  %vm2653_vm7 = vcmp.eq.s32.totalorder %v1900_v25, %v1947_v39 }
  0x38   : > { %1468 = vmatprep.subr.bf16.mxu0 %v1591_v42  ;;  %455 = vxpose.xlu1.c.b16.cont [2/8] %v409_v53, 128  ;;  %v418_v63 = vpack.c.bf16 %v400_v59, %v398_v58  ;;  %v402_v0 = vsel %vm2650_vm8, 1.0, %v1694_v17  ;;  %v404_v1 = vsel %vm2652_vm5, 1.0, %v1694_v17  ;;  %v413_v2 = vpack.c.bf16 %v389_v62, %v387_v61  ;;  %v694_v53 = vld [vmem:[%s2636_s1 + $0x78] sm:$0xff] }
  0x39   : > { %441 = vxpose.xlu0.c.b16.cont [4/8] %v412_v36, 128  ;;  %v391_v4 = vsel %vm359_vm6, 1.0, %v1694_v17  ;;  %v393_v5 = vsel %vm2653_vm7, 1.0, %v1694_v17  ;;  %vm2655_vm8 = vcmp.eq.s32.totalorder %v1918_v29, %v1947_v39  ;;  %vm2654_vm10 = vcmp.eq.s32.totalorder %v1929_v33, %v1947_v39  ;;  %v682_v36 = vld [vmem:[%s2636_s1 + $0x18] sm:$0xff] }
  0x3a   : > { %v420_v10 = vpack.c.bf16 %v404_v1, %v402_v0  ;;  %v415_v16 = vpack.c.bf16 %v393_v5, %v391_v4  ;;  %v395_v18 = vsel %vm2655_vm8, 1.0, %v1694_v17  ;;  %v397_v19 = vsel %vm2654_vm10, 1.0, %v1694_v17 }
  0x3b   : > { %1469 = vmatpush3.bf16.msra.mxu0 %v1591_v42  ;;  %vm367_vm5 = vcmp.eq.s32.totalorder %v1940_v37, %v1947_v39  ;;  %vm2658_vm7 = vcmp.eq.s32.totalorder %v1943_v38, %v1947_v39  ;;  %v417_v20 = vpack.c.bf16 %v397_v19, %v395_v18  ;;  %vm2657_vm10 = vcmp.eq.s32.totalorder %v1993_v49, %v1947_v39  ;;  %v684_v42 = vld [vmem:[%s2636_s1 + $0x28] sm:$0xff] }
  0x3c   : > { %1470 = vmatprep.subr.bf16.mxu0 %v1592_v50  ;;  %456 = vxpose.xlu1.c.b16.cont [3/8] %v411_v60, 128  ;;  %v399_v21 = vsel %vm367_vm5, 1.0, %v1694_v17  ;;  %v401_v22 = vsel %vm2658_vm7, 1.0, %v1694_v17  ;;  %vm2656_vm8 = vcmp.eq.s32.totalorder %v2011_v54, %v1947_v39  ;;  %v403_v26 = vsel %vm2657_vm10, 1.0, %v1694_v17 }
  0x3d   : > { %442 = vxpose.xlu0.c.b16.cont [5/8] %v414_v48, 128  ;;  %v419_v23 = vpack.c.bf16 %v401_v22, %v399_v21  ;;  %v405_v27 = vsel %vm2656_vm8, 1.0, %v1694_v17  ;;  %v2111_v30 = vrot.slane %v2106_v28, %v295_v7  ;;  %v1695_v34 = vmov 0   ;;  %v681_v17 = vld [vmem:[%s2636_s1 + $0x10] sm:$0xff]  ;;  %v680_v7 = vld [vmem:[%s2636_s1 + $0x8] sm:$0xff]  ;;  %v690_v48 = vld [vmem:[%s2636_s1 + $0x58] sm:$0xff] }
  0x3e   : > { %v421_v31 = vpack.c.bf16 %v405_v27, %v403_v26  ;;  %v1696_v41 = vmov 1   ;;  %v2171_v21 = vrot.slane %v2106_v28, %v299_v35 }
  0x3f   : > { %1471 = vmatpush3.bf16.msra.mxu0 %v1592_v50  ;;  %v691_v50 = vld [vmem:[%s2636_s1 + $0x60] sm:$0xff]  ;;  %vm2659_vm8 = vcmp.eq.s32.totalorder %v1831_v3, %v2111_v30  ;;  %vm2660_vm10 = vcmp.eq.s32.totalorder %v1837_v6, %v2111_v30 }
  0x40   : > { %457 = vxpose.xlu1.c.b16.cont [4/8] %v413_v2, 128  ;;  %vm302_vm7 = vcmp.eq.s32.totalorder %v1831_v3, %v2171_v21 }
  0x41   : > { %443 = vxpose.xlu0.c.b16.cont [6/8] %v416_v57, 128 }
  0x44   : > { %458 = vxpose.xlu1.c.b16.cont [5/8] %v415_v16, 128 }
  0x45   : > { %444 = vxpose.xlu0.c.b16.cont [7/8] %v418_v63, 128 }
  0x48   : > { %459 = vxpose.xlu1.c.b16.cont [6/8] %v417_v20, 128 }
  0x49   : > { %445 = vxpose.xlu0.c.b16.end [8/8] %v420_v10, 128 }
  0x4c   : > { %460 = vxpose.xlu1.c.b16.cont [7/8] %v419_v23, 128 }
  0x50   : > { %461 = vxpose.xlu1.c.b16.end [8/8] %v421_v31, 128 }
  0x52   : > { %1581 = vset.pattern.permute.xlu0 %v1695_v34 }
  0x53   : > { %697 = vperm.xlu0 %1581, %v679_v32  }
  0x54   : > { %1582 = vset.pattern.permute.xlu1 %v1695_v34 }
  0x55   : > { %702 = vperm.xlu1 %1582, %v680_v7  }
  0x57   : > { %707 = vperm.xlu0 %1581, %v681_v17  }
  0x59   : > { %1583 = vset.pattern.permute.xlu1 %v1696_v41 }
  0x5a   : > { %808 = vperm.xlu1 %1583, %v679_v32  }
  0x5b   : > { %712 = vperm.xlu0 %1581, %v682_v36  }
  0x5e   : > { %812 = vperm.xlu1 %1583, %v680_v7  }
  0x5f   : > { %717 = vperm.xlu0 %1581, %v683_v40  }
  0x62   : > { %816 = vperm.xlu1 %1583, %v681_v17  }
  0x63   : > { %722 = vperm.xlu0 %1581, %v684_v42  }
  0x66   : > { %820 = vperm.xlu1 %1583, %v682_v36  }
  0x67   : > { %727 = vperm.xlu0 %1581, %v685_v43  }
  0x6a   : > { %824 = vperm.xlu1 %1583, %v683_v40  }
  0x6b   : > { %732 = vperm.xlu0 %1581, %v686_v44  }
  0x6e   : > { %828 = vperm.xlu1 %1583, %v684_v42  }
  0x6f   : > { %737 = vperm.xlu0 %1581, %v687_v45  }
  0x72   : > { %832 = vperm.xlu1 %1583, %v685_v43  }
  0x73   : > { %742 = vperm.xlu0 %1581, %v688_v46  }
  0x76   : > { %836 = vperm.xlu1 %1583, %v686_v44  }
  0x77   : > { %747 = vperm.xlu0 %1581, %v689_v47  }
  0x7a   : > { %840 = vperm.xlu1 %1583, %v687_v45  }
  0x7b   : > { %752 = vperm.xlu0 %1581, %v690_v48  }
  0x7e   : > { %844 = vperm.xlu1 %1583, %v688_v46  }
  0x7f   : > { %757 = vperm.xlu0 %1581, %v691_v50  }
  0x82   : > { %848 = vperm.xlu1 %1583, %v689_v47  }
  0x83   : > { %762 = vperm.xlu0 %1581, %v692_v51  }
  0x86   : > { %852 = vperm.xlu1 %1583, %v690_v48  }
  0x87   : > { %767 = vperm.xlu0 %1581, %v693_v52  }
  0x8a   : > { %856 = vperm.xlu1 %1583, %v691_v50  }
  0x8b   : > { %772 = vperm.xlu0 %1581, %v694_v53  }
  0x8e   : > { %860 = vperm.xlu1 %1583, %v692_v51  }
  0x8f   : > { %1584 = vset.pattern.permute.xlu0 %v1696_v41 }
  0x92   : > { %864 = vperm.xlu1 %1583, %v693_v52  }
  0x93   : > { %v446_v55 = vpop.trf.xlu0 }
  0x94   : > { %1472 = vmatprep.mubr.bf16.mxu0 %v446_v55 }
  0x96   : > { %868 = vperm.xlu1 %1583, %v694_v53  }
  0x97   : > { %v447_v56 = vpop.trf.xlu0 }
  0x98   : > { %1473 = vmatmul.mubr.bf16.vlgmr.msra.gmra.mrb[0].mxu0 %v447_v56 }
  0x9a   : > { %v462_v59 = vpop.trf.xlu1 }
  0x9b   : > { %v448_v57 = vpop.trf.xlu0 }
  0x9c   : > { %1476 = vmatprep.mubr.bf16.mxu0 %v448_v57 }
  0x9e   : > { %v463_v62 = vpop.trf.xlu1 }
  0x9f   : > { %v449_v58 = vpop.trf.xlu0 }
  0xa0   : > { %1477 = vmatmul.mubr.bf16.gmra.mrb[4].mxu0 %v449_v58 }
  0xa2   : > { %v464_v0 = vpop.trf.xlu1 }
  0xa3   : > { %v450_v60 = vpop.trf.xlu0 }
  0xa4   : > { %1480 = vmatprep.mubr.bf16.mxu0 %v450_v60 }
  0xa6   : > { %v465_v2 = vpop.trf.xlu1 }
  0xa7   : > { %v451_v61 = vpop.trf.xlu0 }
  0xa8   : > { %1481 = vmatmul.mubr.bf16.gmra.mrb[8].mxu0 %v451_v61 }
  0xaa   : > { %v466_v4 = vpop.trf.xlu1 }
  0xab   : > { %v452_v63 = vpop.trf.xlu0 }
  0xac   : > { %1484 = vmatprep.mubr.bf16.mxu0 %v452_v63 }
  0xae   : > { %v467_v5 = vpop.trf.xlu1 }
  0xaf   : > { %v453_v1 = vpop.trf.xlu0 }
  0xb0   : > { %1485 = vmatmul.mubr.bf16.gmra.mrb[12].mxu0 %v453_v1 }
  0xb1   : > { %1488 = vmatprep.mubr.bf16.mxu0 %v462_v59 }
  0xb2   : > { %v468_v10 = vpop.trf.xlu1 }
  0xb6   : > { %v469_v16 = vpop.trf.xlu1 }
  0xb8   : > { %1489 = vmatmul.mubr.bf16.gmra.mrb[16].mxu0 %v463_v62 }
  0xb9   : > { %1492 = vmatprep.mubr.bf16.mxu0 %v464_v0 }
  0xc0   : > { %1493 = vmatmul.mubr.bf16.gmra.mrb[20].mxu0 %v465_v2 }
  0xc1   : > { %1496 = vmatprep.mubr.bf16.mxu0 %v466_v4 }
  0xc8   : > { %1497 = vmatmul.mubr.bf16.gmra.mrb[24].mxu0 %v467_v5 }
  0xc9   : > { %1500 = vmatprep.mubr.bf16.mxu0 %v468_v10 }
  0xd0   : > { %1501 = vmatmul.mubr.bf16.gmra.mrb[28].mxu0 %v469_v16 }
  0xd2   : > { %v698_v18 = vpop.permute.xlu0 %697 }
  0xd3   : > { %v775_v19 = vsel %vm2659_vm8, %v698_v18, 0.0  ;;  %vm304_vm8 = vcmp.eq.s32.totalorder %v1837_v6, %v2171_v21  ;;  %v776_v28 = vsel %vm302_vm7, %v698_v18, 0.0 }
  0xd4   : > { %v703_v22 = vpop.permute.xlu1 %702 }
  0xd5   : > { %v777_v26 = vsel %vm2660_vm10, %v703_v22, 0.0  ;;  %v778_v7 = vsel %vm304_vm8, %v703_v22, 0.0  ;;  %vm305_vm10 = vcmp.eq.s32.totalorder %v1841_v8, %v2111_v30 }
  0xd6   : > { %v708_v20 = vpop.permute.xlu0 %707 }
  0xd7   : > { %v779_v45 = vsel %vm305_vm10, %v708_v20, 0.0 }
  0xd9   : > { %v809_v31 = vpop.permute.xlu1 %808 }
  0xda   : > { %v713_v23 = vpop.permute.xlu0 %712  ;;  %v871_v32 = vsel %vm342_vm0, %v809_v31, 0.0  ;;  %v872_v35 = vsel %vm343_vm12, %v809_v31, 0.0  ;;  %vm306_vm0 = vcmp.eq.s32.totalorder %v1841_v8, %v2171_v21  ;;  %vm308_vm12 = vcmp.eq.s32.totalorder %v1844_v9, %v2171_v21 }
  0xdb   : > { %v903_v34 = vadd.f32 %v871_v32, %v775_v19  ;;  %v904_v40 = vadd.f32 %v872_v35, %v776_v28  ;;  %v780_v46 = vsel %vm306_vm0, %v708_v20, 0.0  ;;  %v782_v58 = vsel %vm308_vm12, %v713_v23, 0.0 }
  0xdd   : > { %v813_v36 = vpop.permute.xlu1 %812 }
  0xde   : > { %v718_v27 = vpop.permute.xlu0 %717  ;;  %v873_v41 = vsel %vm344_vm1, %v813_v36, 0.0  ;;  %v874_v42 = vsel %vm345_vm13, %v813_v36, 0.0  ;;  %vm307_vm1 = vcmp.eq.s32.totalorder %v1844_v9, %v2111_v30  ;;  %vm310_vm13 = vcmp.eq.s32.totalorder %v1854_v12, %v2171_v21  ;;  %v1037_v9 = vld [vmem:[%s1809_s29] sm:$0xff] }
  0xdf   : > { %v905_v43 = vadd.f32 %v873_v41, %v777_v26  ;;  %v906_v44 = vadd.f32 %v874_v42, %v778_v7  ;;  %v781_v57 = vsel %vm307_vm1, %v713_v23, 0.0  ;;  %v784_v10 = vsel %vm310_vm13, %v718_v27, 0.0 }
  0xe1   : > { %v935_v48 = vadd.f32 %v905_v43, %v903_v34  ;;  %v817_v50 = vpop.permute.xlu1 %816  ;;  %v956_v51 = vadd.f32 %v906_v44, %v904_v40 }
  0xe2   : > { %v723_v17 = vpop.permute.xlu0 %722  ;;  %v875_v52 = vsel %vm346_vm2, %v817_v50, 0.0  ;;  %v876_v53 = vsel %vm347_vm14, %v817_v50, 0.0  ;;  %vm309_vm2 = vcmp.eq.s32.totalorder %v1854_v12, %v2111_v30  ;;  %vm2234_vm14 = vmpackc.low %vm304_vm8, %vm302_vm7  ;;  %vm312_vm7 = vcmp.eq.s32.totalorder %v1857_v13, %v2171_v21 }
  0xe3   : > { %v907_v55 = vadd.f32 %v875_v52, %v779_v45  ;;  %v908_v56 = vadd.f32 %v876_v53, %v780_v46  ;;  %v783_v5 = vsel %vm309_vm2, %v718_v27, 0.0  ;;  %v786_v32 = vsel %vm312_vm7, %v723_v17, 0.0 }
  0xe4   : > { %vm2662_vm8 = vcmp.eq.s32.totalorder %v1860_v14, %v2111_v30 }
  0xe5   : > { %v936_v60 = vadd.f32 %v935_v48, %v907_v55  ;;  %v821_v61 = vpop.permute.xlu1 %820  ;;  %v957_v62 = vadd.f32 %v956_v51, %v908_v56 }
  0xe6   : > { %v728_v47 = vpop.permute.xlu0 %727  ;;  %v877_v0 = vsel %vm348_vm3, %v821_v61, 0.0  ;;  %v878_v1 = vsel %vm349_vm15, %v821_v61, 0.0  ;;  %vm2661_vm3 = vcmp.eq.s32.totalorder %v1857_v13, %v2111_v30  ;;  %vm2684_vm15 = vcmp.eq.s32.totalorder %v1857_v13, %v1947_v39 }
  0xe7   : > { %v909_v2 = vadd.f32 %v877_v0, %v781_v57  ;;  %v910_v4 = vadd.f32 %v878_v1, %v782_v58  ;;  %v785_v31 = vsel %vm2661_vm3, %v723_v17, 0.0  ;;  %v787_v42 = vsel %vm2662_vm8, %v728_v47, 0.0 }
  0xe8   : > { %vm2663_vm3 = vcmp.eq.s32.totalorder %v1863_v15, %v2111_v30  ;;  %vm318_vm8 = vcmp.eq.s32.totalorder %v1897_v24, %v2171_v21 }
  0xe9   : > { %v937_v18 = vadd.f32 %v936_v60, %v909_v2  ;;  %v825_v19 = vpop.permute.xlu1 %824  ;;  %v958_v20 = vadd.f32 %v957_v62, %v910_v4 }
  0xea   : > { %v733_v59 = vpop.permute.xlu0 %732  ;;  %v879_v22 = vsel %vm350_vm4, %v825_v19, 0.0  ;;  %v880_v23 = vsel %vm351_vm9, %v825_v19, 0.0  ;;  %vm314_vm4 = vcmp.eq.s32.totalorder %v1860_v14, %v2171_v21  ;;  %vm2683_vm9 = vcmp.eq.s32.totalorder %v1857_v13, %v1851_v11 }
  0xeb   : > { %v911_v26 = vadd.f32 %v879_v22, %v783_v5  ;;  %v912_v27 = vadd.f32 %v880_v23, %v784_v10  ;;  %v788_v43 = vsel %vm314_vm4, %v728_v47, 0.0  ;;  %v789_v53 = vsel %vm2663_vm3, %v733_v59, 0.0 }
  0xec   : > { %vm2687_vm3 = vcmp.eq.s32.totalorder %v1863_v15, %v1947_v39 }
  0xed   : > { %v938_v35 = vadd.f32 %v937_v18, %v911_v26  ;;  %v829_v28 = vpop.permute.xlu1 %828  ;;  %v959_v7 = vadd.f32 %v958_v20, %v912_v27 }
  0xee   : > { %v738_v16 = vpop.permute.xlu0 %737  ;;  %v881_v36 = vsel %vm2683_vm9, %v829_v28, 0.0  ;;  %v882_v40 = vsel %vm2684_vm15, %v829_v28, 0.0  ;;  %vm2664_vm9 = vcmp.eq.s32.totalorder %v1863_v15, %v2171_v21  ;;  %vm2685_vm15 = vcmp.eq.s32.totalorder %v1860_v14, %v1851_v11 }
  0xef   : > { %v913_v41 = vadd.f32 %v881_v36, %v785_v31  ;;  %v914_v17 = vadd.f32 %v882_v40, %v786_v32  ;;  %v790_v55 = vsel %vm2664_vm9, %v733_v59, 0.0  ;;  %v792_v1 = vsel %vm318_vm8, %v738_v16, 0.0 }
  0xf0   : > { %vm2666_vm9 = vcmp.eq.s32.totalorder %v1900_v25, %v2111_v30 }
  0xf1   : > { %v939_v44 = vadd.f32 %v938_v35, %v913_v41  ;;  %v833_v45 = vpop.permute.xlu1 %832  ;;  %v960_v46 = vadd.f32 %v959_v7, %v914_v17 }
  0xf2   : > { %v743_v34 = vpop.permute.xlu0 %742  ;;  %v883_v48 = vsel %vm2685_vm15, %v833_v45, 0.0  ;;  %v884_v50 = vsel %vm355_vm11, %v833_v45, 0.0  ;;  %vm2665_vm15 = vcmp.eq.s32.totalorder %v1897_v24, %v2111_v30  ;;  %vm2686_vm11 = vcmp.eq.s32.totalorder %v1863_v15, %v1851_v11 }
  0xf3   : > { %v915_v51 = vadd.f32 %v883_v48, %v787_v42  ;;  %v916_v52 = vadd.f32 %v884_v50, %v788_v43  ;;  %v791_v59 = vsel %vm2665_vm15, %v738_v16, 0.0  ;;  %v793_v22 = vsel %vm2666_vm9, %v743_v34, 0.0 }
  0xf4   : > { %vm2668_vm15 = vcmp.eq.s32.totalorder %v1918_v29, %v2111_v30  ;;  %vm2690_vm9 = vcmp.eq.s32.totalorder %v1900_v25, %v1947_v39 }
  0xf5   : > { %v940_v56 = vadd.f32 %v939_v44, %v915_v51  ;;  %v837_v57 = vpop.permute.xlu1 %836  ;;  %v961_v58 = vadd.f32 %v960_v46, %v916_v52 }
  0xf6   : > { %v748_v47 = vpop.permute.xlu0 %747  ;;  %v885_v60 = vsel %vm2686_vm11, %v837_v57, 0.0  ;;  %v886_v61 = vsel %vm2687_vm3, %v837_v57, 0.0  ;;  %vm2667_vm11 = vcmp.eq.s32.totalorder %v1900_v25, %v2171_v21  ;;  %vm2688_vm3 = vcmp.eq.s32.totalorder %v1897_v24, %v1851_v11 }
  0xf7   : > { %v917_v62 = vadd.f32 %v885_v60, %v789_v53  ;;  %v918_v0 = vadd.f32 %v886_v61, %v790_v55  ;;  %v794_v23 = vsel %vm2667_vm11, %v743_v34, 0.0  ;;  %v795_v36 = vsel %vm2668_vm15, %v748_v47, 0.0 }
  0xf8   : > { %vm2671_vm11 = vcmp.eq.s32.totalorder %v1929_v33, %v2171_v21  ;;  %vm2692_vm15 = vcmp.eq.s32.totalorder %v1918_v29, %v1947_v39 }
  0xf9   : > { %v941_v2 = vadd.f32 %v940_v56, %v917_v62  ;;  %v841_v4 = vpop.permute.xlu1 %840  ;;  %v962_v10 = vadd.f32 %v961_v58, %v918_v0 }
  0xfa   : > { %v753_v5 = vpop.permute.xlu0 %752  ;;  %v887_v18 = vsel %vm2688_vm3, %v841_v4, 0.0  ;;  %v888_v19 = vsel %vm359_vm6, %v841_v4, 0.0  ;;  %vm2669_vm3 = vcmp.eq.s32.totalorder %v1918_v29, %v2171_v21  ;;  %vm2689_vm6 = vcmp.eq.s32.totalorder %v1900_v25, %v1851_v11 }
  0xfb   : > { %v919_v20 = vadd.f32 %v887_v18, %v791_v59  ;;  %v920_v16 = vadd.f32 %v888_v19, %v792_v1  ;;  %v796_v40 = vsel %vm2669_vm3, %v748_v47, 0.0  ;;  %v798_v50 = vsel %vm2671_vm11, %v753_v5, 0.0 }
  0xfc   : > { %vm2672_vm3 = vcmp.eq.s32.totalorder %v1940_v37, %v2111_v30  ;;  %vm2673_vm11 = vcmp.eq.s32.totalorder %v1943_v38, %v2111_v30 }
  0xfd   : > { %v942_v26 = vadd.f32 %v941_v2, %v919_v20  ;;  %v845_v27 = vpop.permute.xlu1 %844  ;;  %v963_v31 = vadd.f32 %v962_v10, %v920_v16 }
  0xfe   : > { %v889_v32 = vsel %vm2689_vm6, %v845_v27, 0.0  ;;  %v890_v35 = vsel %vm2690_vm9, %v845_v27, 0.0  ;;  %v758_v34 = vpop.permute.xlu0 %757  ;;  %vm2670_vm6 = vcmp.eq.s32.totalorder %v1929_v33, %v2111_v30  ;;  %vm2691_vm9 = vcmp.eq.s32.totalorder %v1918_v29, %v1851_v11 }
  0xff   : > { %v921_v28 = vadd.f32 %v889_v32, %v793_v22  ;;  %v922_v7 = vadd.f32 %v890_v35, %v794_v23  ;;  %v797_v48 = vsel %vm2670_vm6, %v753_v5, 0.0  ;;  %vm2694_vm6 = vcmp.eq.s32.totalorder %v1929_v33, %v1947_v39 }
 0x100   : > { %v799_v60 = vsel %vm2672_vm3, %v758_v34, 0.0  ;;  %vm2678_vm3 = vcmp.eq.s32.totalorder %v1993_v49, %v2171_v21 }
 0x101   : > { %v943_v41 = vadd.f32 %v942_v26, %v921_v28  ;;  %v849_v17 = vpop.permute.xlu1 %848  ;;  %v964_v42 = vadd.f32 %v963_v31, %v922_v7 }
 0x102   : > { %v891_v43 = vsel %vm2691_vm9, %v849_v17, 0.0  ;;  %v892_v44 = vsel %vm2692_vm15, %v849_v17, 0.0  ;;  %vm326_vm9 = vcmp.eq.s32.totalorder %v1940_v37, %v2171_v21  ;;  %v763_v47 = vpop.permute.xlu0 %762  ;;  %vm2693_vm15 = vcmp.eq.s32.totalorder %v1929_v33, %v1851_v11 }
 0x103   : > { %v923_v45 = vadd.f32 %v891_v43, %v795_v36  ;;  %v924_v46 = vadd.f32 %v892_v44, %v796_v40  ;;  %v800_v61 = vsel %vm326_vm9, %v758_v34, 0.0  ;;  %v801_v18 = vsel %vm2673_vm11, %v763_v47, 0.0 }
 0x104   : > { %vm2697_vm11 = vcmp.eq.s32.totalorder %v1943_v38, %v1947_v39 }
 0x105   : > { %v944_v51 = vadd.f32 %v943_v41, %v923_v45  ;;  %v853_v52 = vpop.permute.xlu1 %852  ;;  %v965_v53 = vadd.f32 %v964_v42, %v924_v46 }
 0x106   : > { %v893_v55 = vsel %vm2693_vm15, %v853_v52, 0.0  ;;  %v894_v56 = vsel %vm2694_vm6, %v853_v52, 0.0  ;;  %vm2674_vm15 = vcmp.eq.s32.totalorder %v1943_v38, %v2171_v21  ;;  %vm2695_vm6 = vcmp.eq.s32.totalorder %v1940_v37, %v1851_v11  ;;  %v768_v10 = vpop.permute.xlu0 %767 }
 0x107   : > { %v925_v57 = vadd.f32 %v893_v55, %v797_v48  ;;  %v926_v58 = vadd.f32 %v894_v56, %v798_v50  ;;  %v802_v19 = vsel %vm2674_vm15, %v763_v47, 0.0  ;;  %v804_v35 = vsel %vm2678_vm3, %v768_v10, 0.0 }
 0x108   : > { %vm2676_vm15 = vcmp.eq.s32.totalorder %v2011_v54, %v2111_v30 }
 0x109   : > { %v945_v62 = vadd.f32 %v944_v51, %v925_v57  ;;  %v857_v0 = vpop.permute.xlu1 %856  ;;  %v966_v59 = vadd.f32 %v965_v53, %v926_v58 }
 0x10a   : > { %v895_v1 = vsel %vm2695_vm6, %v857_v0, 0.0  ;;  %v896_v2 = vsel %vm367_vm5, %v857_v0, 0.0  ;;  %vm2675_vm6 = vcmp.eq.s32.totalorder %v1993_v49, %v2111_v30  ;;  %vm2696_vm5 = vcmp.eq.s32.totalorder %v1943_v38, %v1851_v11  ;;  %v773_v34 = vpop.permute.xlu0 %772 }
 0x10b   : > { %v927_v4 = vadd.f32 %v895_v1, %v799_v60  ;;  %v928_v5 = vadd.f32 %v896_v2, %v800_v61  ;;  %v803_v32 = vsel %vm2675_vm6, %v768_v10, 0.0  ;;  %vm2699_vm6 = vcmp.eq.s32.totalorder %v1993_v49, %v1947_v39 }
 0x10c   : > { %v805_v43 = vsel %vm2676_vm15, %v773_v34, 0.0 }
 0x10d   : > { %v946_v20 = vadd.f32 %v945_v62, %v927_v4  ;;  %v861_v16 = vpop.permute.xlu1 %860  ;;  %v967_v22 = vadd.f32 %v966_v59, %v928_v5 }
 0x10e   : > { %v897_v23 = vsel %vm2696_vm5, %v861_v16, 0.0  ;;  %v898_v26 = vsel %vm2697_vm11, %v861_v16, 0.0  ;;  %vm2677_vm5 = vcmp.eq.s32.totalorder %v2011_v54, %v2171_v21  ;;  %vm2698_vm11 = vcmp.eq.s32.totalorder %v1993_v49, %v1851_v11 }
 0x10f   : > { %v929_v27 = vadd.f32 %v897_v23, %v801_v18  ;;  %v930_v31 = vadd.f32 %v898_v26, %v802_v19  ;;  %v806_v44 = vsel %vm2677_vm5, %v773_v34, 0.0  ;;  %vm2702_vm5 = vcmp.eq.s32.totalorder %v1831_v3, %v2111_v30 }
 0x111   : > { %v947_v28 = vadd.f32 %v946_v20, %v929_v27  ;;  %v865_v7 = vpop.permute.xlu1 %864  ;;  %v968_v36 = vadd.f32 %v967_v22, %v930_v31 }
 0x112   : > { %v899_v40 = vsel %vm2698_vm11, %v865_v7, 0.0  ;;  %v900_v41 = vsel %vm2699_vm6, %v865_v7, 0.0  ;;  %vm2700_vm11 = vcmp.eq.s32.totalorder %v2011_v54, %v1851_v11  ;;  %vm2701_vm6 = vcmp.eq.s32.totalorder %v2011_v54, %v1947_v39 }
 0x113   : > { %v931_v17 = vadd.f32 %v899_v40, %v803_v32  ;;  %v932_v42 = vadd.f32 %v900_v41, %v804_v35 }
 0x115   : > { %v948_v45 = vadd.f32 %v947_v28, %v931_v17  ;;  %v869_v46 = vpop.permute.xlu1 %868  ;;  %v969_v48 = vadd.f32 %v968_v36, %v932_v42 }
 0x116   : > { %v901_v50 = vsel %vm2700_vm11, %v869_v46, 0.0  ;;  %v902_v51 = vsel %vm2701_vm6, %v869_v46, 0.0  ;;  %vm2703_vm11 = vcmp.eq.s32.totalorder %v1837_v6, %v2111_v30  ;;  %vm1326_vm6 = vmpackc.low %vm312_vm7, %vm310_vm13  ;;  %vm2708_vm13 = vcmp.eq.s32.totalorder %v1860_v14, %v2111_v30 }
 0x117   : > { %v933_v52 = vadd.f32 %v901_v50, %v805_v43  ;;  %v934_v47 = vadd.f32 %v902_v51, %v806_v44  ;;  %vm2438_vm3 = vmpackc.low %vm2703_vm11, %vm2702_vm5  ;;  %vm2709_vm7 = vcmp.eq.s32.totalorder %v1863_v15, %v2111_v30 }
 0x118   : > { %vm1323_vm5 = vmpackc.low %vm307_vm1, %vm305_vm10  ;;  %vm2707_vm10 = vcmp.eq.s32.totalorder %v1863_v15, %v2171_v21  ;;  %v1038_v15 = vld [vmem:[%s1809_s29 + $0x8] sm:$0xff] }
 0x119   : > { %v949_v53 = vadd.f32 %v948_v45, %v933_v52  ;;  %v970_v55 = vadd.f32 %v969_v48, %v934_v47  ;;  %vm1332_vm1 = vmpackc.low %vm2707_vm10, %vm314_vm4  ;;  %vm2711_vm4 = vcmp.eq.s32.totalorder %v1897_v24, %v2111_v30 }
 0x11b   : > { %v971_v56 = vrot.slane %v970_v55, 4  ;;  %v950_v31 = vrot.slane %v949_v53, 4 }
 0x11d   : > { %v972_v57 = vadd.f32 %v971_v56, %v970_v55  ;;  %v951_v63 = vadd.f32 %v950_v31, %v949_v53 }
 0x11f   : > { %v973_v58 = vrot.slane %v972_v57, 2  ;;  %v952_v40 = vrot.slane %v951_v63, 2 }
 0x121   : > { %v974_v60 = vadd.f32 %v973_v58, %v972_v57  ;;  %v953_v45 = vadd.f32 %v952_v40, %v951_v63 }
 0x123   : > { %v975_v61 = vrot.slane %v974_v60, 1  ;;  %v954_v48 = vrot.slane %v953_v45, 1 }
 0x125   : > { %v976_v62 = vadd.f32 %v975_v61, %v974_v60  ;;  %v955_v56 = vadd.f32 %v954_v48, %v953_v45 }
 0x127   : > { %vm978_vm15 = vcmp.gt.f32.partialorder %v976_v62, 0.0  ;;  %v980_v0 = vmul.f32 0.2, %v976_v62  ;;  %v979_v53 = vmul.f32 0.2, %v955_v56 }
 0x129   : > { %v982_v39 = vsel %vm978_vm15, %v976_v62, %v980_v0  ;;  %vm1320_vm15 = vmpackc.low %vm308_vm12, %vm306_vm0  ;;  %vm2706_vm0 = vcmp.eq.s32.totalorder %v1857_v13, %v2111_v30 }
 0x12a   : > { %v984_v59 = vsub.f32 0.0, %v982_v39  ;;  %vm1329_vm12 = vmpackc.low %vm2706_vm0, %vm309_vm2  ;;  %vm2710_vm2 = vcmp.eq.s32.totalorder %v1900_v25, %v2171_v21 }
 0x12b   : > { %vm1338_vm11 = vmpackc.low %vm2710_vm2, %vm318_vm8  ;;  %vm2715_vm8 = vcmp.eq.s32.totalorder %v1918_v29, %v2111_v30 }
 0x12c   : > { %v987_v1 = vmul.f32 1.442695, %v984_v59 }
 0x12e   : > { %1593 = vpow2.f32 %v987_v1 }
 0x138   : > { %v1594_v2 = vpop.eup %1593 }
 0x139   : > { %v2442_v4 = vpack.c.bf16 %v1594_v2, %v1594_v2 }
 0x13b   : > { %1316 = vmatprep.mubr.msk.bf16.mxu1 %vm2234_vm14, %v2442_v4  ;;  %vm977_vm14 = vcmp.gt.f32.partialorder %v955_v56, 0.0 }
 0x13c   : > { %v981_v39 = vsel %vm977_vm14, %v955_v56, %v979_v53  ;;  %vm2712_vm14 = vcmp.eq.s32.totalorder %v1900_v25, %v2111_v30 }
 0x13d   : > { %v983_v1 = vsub.f32 0.0, %v981_v39 }
 0x16b   : > { %v1474_v5 = vpop.f32.mrb[0].mxu0 }
 0x16c   : > { %v552_v3 = vpop.f32.mrb[1].mxu0 }
 0x16d   : > { %v1475_v10 = vpop.f32.mrb[2].mxu0 }
 0x16e   : > { %v1054_v18 = vpack.c.bf16 %v1475_v10, %v1474_v5  ;;  %v555_v6 = vpop.f32.mrb[3].mxu0  ;;  %v985_v10 = vmul.f32 1.442695, %v983_v1 }
 0x16f   : > { %v1053_v19 = vpack.c.bf16 %v555_v6, %v552_v3 }
 0x170   : > { %1595 = vpow2.f32 %v985_v10 }
 0x173   : > { %v1478_v20 = vpop.f32.mrb[4].mxu0 }
 0x174   : > { %v568_v16 = vpop.f32.mrb[5].mxu0 }
 0x175   : > { %v1479_v22 = vpop.f32.mrb[6].mxu0 }
 0x176   : > { %v1056_v23 = vpack.c.bf16 %v1479_v22, %v1478_v20  ;;  %v571_v26 = vpop.f32.mrb[7].mxu0 }
 0x177   : > { %v1055_v27 = vpack.c.bf16 %v571_v26, %v568_v16 }
 0x17b   : > { %v1482_v32 = vpop.f32.mrb[8].mxu0 }
 0x17c   : > { %v584_v35 = vpop.f32.mrb[9].mxu0 }
 0x17d   : > { %v1483_v28 = vpop.f32.mrb[10].mxu0 }
 0x17e   : > { %v1058_v7 = vpack.c.bf16 %v1483_v28, %v1482_v32  ;;  %v587_v34 = vpop.f32.mrb[11].mxu0  ;;  %v1596_v32 = vpop.eup %1595 }
 0x17f   : > { %v1057_v36 = vpack.c.bf16 %v587_v34, %v584_v35  ;;  %v1318_v35 = vpack.c.bf16 %v1596_v32, %v1596_v32  ;;  %v1041_v34 = vld [vmem:[%s1809_s29 + $0x20] sm:$0xff] }
 0x183   : > { %v1486_v41 = vpop.f32.mrb[12].mxu0 }
 0x184   : > { %v600_v17 = vpop.f32.mrb[13].mxu0 }
 0x185   : > { %v1487_v42 = vpop.f32.mrb[14].mxu0 }
 0x186   : > { %v1060_v43 = vpack.c.bf16 %v1487_v42, %v1486_v41  ;;  %v603_v44 = vpop.f32.mrb[15].mxu0  ;;  %v1042_v41 = vld [vmem:[%s1809_s29 + $0x28] sm:$0xff] }
 0x187   : > { %v1059_v46 = vpack.c.bf16 %v603_v44, %v600_v17 }
 0x18b   : > { %v1490_v50 = vpop.f32.mrb[16].mxu0 }
 0x18c   : > { %v616_v51 = vpop.f32.mrb[17].mxu0 }
 0x18d   : > { %v1491_v52 = vpop.f32.mrb[18].mxu0 }
 0x18e   : > { %v1062_v47 = vpack.c.bf16 %v1491_v52, %v1490_v50  ;;  %v619_v55 = vpop.f32.mrb[19].mxu0  ;;  %v1044_v52 = vld [vmem:[%s1809_s29 + $0x38] sm:$0xff] }
 0x18f   : > { %v1061_v57 = vpack.c.bf16 %v619_v55, %v616_v51 }
 0x191   : > { %1392 = vmatprep.subr.bf16.mxu1 %v1061_v57 }
 0x192   : > { %1393 = vmatpush3.bf16.msra.mxu1 %v1053_v19 }
 0x193   : > { %v1494_v58 = vpop.f32.mrb[20].mxu0  ;;  %1394 = vmatprep.subr.bf16.mxu1 %v1062_v47 }
 0x194   : > { %v632_v60 = vpop.f32.mrb[21].mxu0 }
 0x195   : > { %v1495_v61 = vpop.f32.mrb[22].mxu0 }
 0x196   : > { %v1064_v62 = vpack.c.bf16 %v1495_v61, %v1494_v58  ;;  %v635_v0 = vpop.f32.mrb[23].mxu0  ;;  %1395 = vmatpush3.bf16.msra.mxu1 %v1054_v18  ;;  %v1045_v58 = vld [vmem:[%s1809_s29 + $0x40] sm:$0xff] }
 0x197   : > { %v1063_v59 = vpack.c.bf16 %v635_v0, %v632_v60  ;;  %v1046_v0 = vld [vmem:[%s1809_s29 + $0x48] sm:$0xff] }
 0x199   : > { %1396 = vmatprep.subr.bf16.mxu1 %v1063_v59 }
 0x19a   : > { %1397 = vmatpush3.bf16.msra.mxu1 %v1055_v27 }
 0x19b   : > { %v1498_v2 = vpop.f32.mrb[24].mxu0  ;;  %1398 = vmatprep.subr.bf16.mxu1 %v1064_v62 }
 0x19c   : > { %v648_v5 = vpop.f32.mrb[25].mxu0 }
 0x19d   : > { %v1499_v3 = vpop.f32.mrb[26].mxu0 }
 0x19e   : > { %v1066_v6 = vpack.c.bf16 %v1499_v3, %v1498_v2  ;;  %v651_v19 = vpop.f32.mrb[27].mxu0  ;;  %1399 = vmatpush3.bf16.msra.mxu1 %v1056_v23  ;;  %v1047_v3 = vld [vmem:[%s1809_s29 + $0x50] sm:$0xff] }
 0x19f   : > { %v1065_v20 = vpack.c.bf16 %v651_v19, %v648_v5 }
 0x1a1   : > { %1400 = vmatprep.subr.bf16.mxu1 %v1065_v20  ;;  %v1048_v20 = vld [vmem:[%s1809_s29 + $0x58] sm:$0xff] }
 0x1a2   : > { %1401 = vmatpush3.bf16.msra.mxu1 %v1057_v36 }
 0x1a3   : > { %v1502_v16 = vpop.f32.mrb[28].mxu0  ;;  %1402 = vmatprep.subr.bf16.mxu1 %v1066_v6 }
 0x1a4   : > { %v664_v18 = vpop.f32.mrb[29].mxu0 }
 0x1a5   : > { %v1503_v22 = vpop.f32.mrb[30].mxu0 }
 0x1a6   : > { %v1068_v26 = vpack.c.bf16 %v1503_v22, %v1502_v16  ;;  %v667_v31 = vpop.f32.mrb[31].mxu0  ;;  %1403 = vmatpush3.bf16.msra.mxu1 %v1058_v7 }
 0x1a7   : > { %v1067_v27 = vpack.c.bf16 %v667_v31, %v664_v18 }
 0x1a9   : > { %1404 = vmatprep.subr.bf16.mxu1 %v1067_v27  ;;  %v1049_v27 = vld [vmem:[%s1809_s29 + $0x60] sm:$0xff] }
 0x1aa   : > { %1405 = vmatpush3.bf16.msra.mxu1 %v1059_v46  ;;  %v1043_v46 = vld [vmem:[%s1809_s29 + $0x30] sm:$0xff] }
 0x1ab   : > { %1406 = vmatprep.subr.bf16.mxu1 %v1068_v26 }
 0x1ae   : > { %1407 = vmatpush3.bf16.msra.mxu1 %v1060_v43 }
 0x1b1   : > { %1319 = vmatmul.mubr.msk.bf16.vlgmr.msra.gmra.mrb[0].mxu1 %vm2438_vm3, %v1318_v35  ;;  %vm1335_vm3 = vmpackc.low %vm2709_vm7, %vm2708_vm13  ;;  %vm2718_vm7 = vcmp.eq.s32.totalorder %v1940_v37, %v2111_v30 }
 0x1b2   : > { %1322 = vmatprep.mubr.msk.bf16.mxu1 %vm1320_vm15, %v2442_v4  ;;  %vm1341_vm15 = vmpackc.low %vm2712_vm14, %vm2711_vm4  ;;  %vm2721_vm4 = vcmp.eq.s32.totalorder %v2011_v54, %v2171_v21 }
 0x1b9   : > { %1325 = vmatmul.mubr.msk.bf16.gmra.mrb[4].mxu1 %vm1323_vm5, %v1318_v35  ;;  %vm2713_vm5 = vcmp.eq.s32.totalorder %v1918_v29, %v2171_v21 }
 0x1ba   : > { %1328 = vmatprep.mubr.msk.bf16.mxu1 %vm1326_vm6, %v2442_v4  ;;  %vm2714_vm6 = vcmp.eq.s32.totalorder %v1929_v33, %v2171_v21 }
 0x1bb   : > { %vm1344_vm0 = vmpackc.low %vm2714_vm6, %vm2713_vm5 }
 0x1c1   : > { %1331 = vmatmul.mubr.msk.bf16.gmra.mrb[8].mxu1 %vm1329_vm12, %v1318_v35  ;;  %vm2716_vm12 = vcmp.eq.s32.totalorder %v1929_v33, %v2111_v30 }
 0x1c2   : > { %1334 = vmatprep.mubr.msk.bf16.mxu1 %vm1332_vm1, %v2442_v4  ;;  %vm1347_vm10 = vmpackc.low %vm2716_vm12, %vm2715_vm8  ;;  %vm2717_vm1 = vcmp.eq.s32.totalorder %v1943_v38, %v2171_v21 }
 0x1c3   : > { %vm1350_vm13 = vmpackc.low %vm2717_vm1, %vm326_vm9  ;;  %vm2722_vm9 = vcmp.eq.s32.totalorder %v1993_v49, %v2111_v30 }
 0x1c9   : > { %1337 = vmatmul.mubr.msk.bf16.gmra.mrb[12].mxu1 %vm1335_vm3, %v1318_v35  ;;  %vm2719_vm3 = vcmp.eq.s32.totalorder %v1943_v38, %v2111_v30  ;;  %v1039_v38 = vld [vmem:[%s1809_s29 + $0x10] sm:$0xff] }
 0x1ca   : > { %1340 = vmatprep.mubr.msk.bf16.mxu1 %vm1338_vm11, %v2442_v4  ;;  %vm1353_vm2 = vmpackc.low %vm2719_vm3, %vm2718_vm7  ;;  %vm2720_vm11 = vcmp.eq.s32.totalorder %v1993_v49, %v2171_v21  ;;  %v1040_v21 = vld [vmem:[%s1809_s29 + $0x18] sm:$0xff] }
 0x1cb   : > { %vm1356_vm14 = vmpackc.low %vm2721_vm4, %vm2720_vm11 }
 0x1d1   : > { %1343 = vmatmul.mubr.msk.bf16.gmra.mrb[16].mxu1 %vm1341_vm15, %v1318_v35  ;;  %vm2723_vm15 = vcmp.eq.s32.totalorder %v2011_v54, %v2111_v30 }
 0x1d2   : > { %1346 = vmatprep.mubr.msk.bf16.mxu1 %vm1344_vm0, %v2442_v4  ;;  %vm1359_vm5 = vmpackc.low %vm2723_vm15, %vm2722_vm9 }
 0x1d9   : > { %1349 = vmatmul.mubr.msk.bf16.gmra.mrb[20].mxu1 %vm1347_vm10, %v1318_v35 }
 0x1da   : > { %1352 = vmatprep.mubr.msk.bf16.mxu1 %vm1350_vm13, %v2442_v4 }
 0x1e1   : > { %1355 = vmatmul.mubr.msk.bf16.gmra.mrb[24].mxu1 %vm1353_vm2, %v1318_v35 }
 0x1e2   : > { %1358 = vmatprep.mubr.msk.bf16.mxu1 %vm1356_vm14, %v2442_v4 }
 0x1e9   : > { %1361 = vmatmul.mubr.msk.bf16.gmra.mrb[28].mxu1 %vm1359_vm5, %v1318_v35 }
 0x284   : > { %v1408_v8 = vpop.f32.mrb[0].mxu1 }
 0x285   : > { %v1409_v12 = vpop.f32.mrb[1].mxu1 }
 0x286   : > { %v1410_v13 = vadd.f32 %v1409_v12, %v1408_v8  ;;  %v1411_v14 = vpop.f32.mrb[2].mxu1 }
 0x287   : > { %v1412_v24 = vpop.f32.mrb[3].mxu1 }
 0x288   : > { %v1166_v25 = vadd.f32 %v1410_v13, %v1037_v9  ;;  %v1413_v29 = vadd.f32 %v1412_v24, %v1411_v14  ;;  %v1050_v9 = vld [vmem:[%s1809_s29 + $0x68] sm:$0xff] }
 0x28a   : > { %1182 = vst [vmem:[%s1809_s29] sm:$0xff] %v1166_v25  ;;  %v1167_v33 = vadd.f32 %v1413_v29, %v1038_v15  ;;  %v1051_v25 = vld [vmem:[%s1809_s29 + $0x70] sm:$0xff] }
 0x28c   : > { %1183 = vst [vmem:[%s1809_s29 + $0x8] sm:$0xff] %v1167_v33  ;;  %v1414_v37 = vpop.f32.mrb[4].mxu1 }
 0x28d   : > { %v1415_v49 = vpop.f32.mrb[5].mxu1 }
 0x28e   : > { %v1416_v54 = vadd.f32 %v1415_v49, %v1414_v37  ;;  %v1417_v30 = vpop.f32.mrb[6].mxu1 }
 0x28f   : > { %v1418_v11 = vpop.f32.mrb[7].mxu1 }
 0x290   : > { %v1168_v4 = vadd.f32 %v1416_v54, %v1039_v38  ;;  %v1419_v23 = vadd.f32 %v1418_v11, %v1417_v30  ;;  %v1052_v38 = vld [vmem:[%s1809_s29 + $0x78] sm:$0xff] }
 0x292   : > { %1184 = vst [vmem:[%s1809_s29 + $0x10] sm:$0xff] %v1168_v4  ;;  %v1169_v28 = vadd.f32 %v1419_v23, %v1040_v21 }
 0x294   : > { %1185 = vst [vmem:[%s1809_s29 + $0x18] sm:$0xff] %v1169_v28  ;;  %v1420_v7 = vpop.f32.mrb[8].mxu1 }
 0x295   : > { %v1421_v63 = vpop.f32.mrb[9].mxu1 }
 0x296   : > { %v1422_v36 = vadd.f32 %v1421_v63, %v1420_v7  ;;  %v1423_v40 = vpop.f32.mrb[10].mxu1 }
 0x297   : > { %v1424_v17 = vpop.f32.mrb[11].mxu1 }
 0x298   : > { %v1170_v42 = vadd.f32 %v1422_v36, %v1041_v34  ;;  %v1425_v43 = vadd.f32 %v1424_v17, %v1423_v40 }
 0x29a   : > { %1186 = vst [vmem:[%s1809_s29 + $0x20] sm:$0xff] %v1170_v42  ;;  %v1171_v44 = vadd.f32 %v1425_v43, %v1042_v41 }
 0x29c   : > { %1187 = vst [vmem:[%s1809_s29 + $0x28] sm:$0xff] %v1171_v44  ;;  %v1426_v45 = vpop.f32.mrb[12].mxu1 }
 0x29d   : > { %v1427_v48 = vpop.f32.mrb[13].mxu1 }
 0x29e   : > { %v1428_v50 = vadd.f32 %v1427_v48, %v1426_v45  ;;  %v1429_v51 = vpop.f32.mrb[14].mxu1 }
 0x29f   : > { %v1430_v47 = vpop.f32.mrb[15].mxu1 }
 0x2a0   : > { %v1172_v55 = vadd.f32 %v1428_v50, %v1043_v46  ;;  %v1431_v56 = vadd.f32 %v1430_v47, %v1429_v51 }
 0x2a2   : > { %1188 = vst [vmem:[%s1809_s29 + $0x30] sm:$0xff] %v1172_v55  ;;  %v1173_v57 = vadd.f32 %v1431_v56, %v1044_v52 }
 0x2a4   : > { %1189 = vst [vmem:[%s1809_s29 + $0x38] sm:$0xff] %v1173_v57  ;;  %v1432_v53 = vpop.f32.mrb[16].mxu1 }
 0x2a5   : > { %v1433_v60 = vpop.f32.mrb[17].mxu1 }
 0x2a6   : > { %v1434_v61 = vadd.f32 %v1433_v60, %v1432_v53  ;;  %v1435_v62 = vpop.f32.mrb[18].mxu1 }
 0x2a7   : > { %v1436_v39 = vpop.f32.mrb[19].mxu1 }
 0x2a8   : > { %v1174_v59 = vadd.f32 %v1434_v61, %v1045_v58  ;;  %v1437_v1 = vadd.f32 %v1436_v39, %v1435_v62 }
 0x2aa   : > { %1190 = vst [vmem:[%s1809_s29 + $0x40] sm:$0xff] %v1174_v59  ;;  %v1175_v2 = vadd.f32 %v1437_v1, %v1046_v0 }
 0x2ac   : > { %1191 = vst [vmem:[%s1809_s29 + $0x48] sm:$0xff] %v1175_v2  ;;  %v1438_v5 = vpop.f32.mrb[20].mxu1 }
 0x2ad   : > { %v1439_v10 = vpop.f32.mrb[21].mxu1 }
 0x2ae   : > { %v1440_v6 = vadd.f32 %v1439_v10, %v1438_v5  ;;  %v1441_v19 = vpop.f32.mrb[22].mxu1 }
 0x2af   : > { %v1442_v16 = vpop.f32.mrb[23].mxu1 }
 0x2b0   : > { %v1176_v18 = vadd.f32 %v1440_v6, %v1047_v3  ;;  %v1443_v22 = vadd.f32 %v1442_v16, %v1441_v19 }
 0x2b2   : > { %1192 = vst [vmem:[%s1809_s29 + $0x50] sm:$0xff] %v1176_v18  ;;  %v1177_v26 = vadd.f32 %v1443_v22, %v1048_v20 }
 0x2b4   : > { %1193 = vst [vmem:[%s1809_s29 + $0x58] sm:$0xff] %v1177_v26  ;;  %v1444_v31 = vpop.f32.mrb[24].mxu1 }
 0x2b5   : > { %v1445_v32 = vpop.f32.mrb[25].mxu1 }
 0x2b6   : > { %v1446_v35 = vadd.f32 %v1445_v32, %v1444_v31  ;;  %v1447_v8 = vpop.f32.mrb[26].mxu1 }
 0x2b7   : > { %v1448_v12 = vpop.f32.mrb[27].mxu1 }
 0x2b8   : > { %v1178_v13 = vadd.f32 %v1446_v35, %v1049_v27  ;;  %v1449_v14 = vadd.f32 %v1448_v12, %v1447_v8 }
 0x2ba   : > { %1194 = vst [vmem:[%s1809_s29 + $0x60] sm:$0xff] %v1178_v13  ;;  %v1179_v15 = vadd.f32 %v1449_v14, %v1050_v9 }
 0x2bc   : > { %1195 = vst [vmem:[%s1809_s29 + $0x68] sm:$0xff] %v1179_v15  ;;  %v1450_v24 = vpop.f32.mrb[28].mxu1 }
 0x2bd   : > { %v1451_v29 = vpop.f32.mrb[29].mxu1 }
 0x2be   : > { %v1452_v33 = vadd.f32 %v1451_v29, %v1450_v24  ;;  %v1453_v37 = vpop.f32.mrb[30].mxu1 }
 0x2bf   : > { %v1454_v49 = vpop.f32.mrb[31].mxu1 }
 0x2c0   : > { %v1180_v54 = vadd.f32 %v1452_v33, %v1051_v25  ;;  %v1455_v30 = vadd.f32 %v1454_v49, %v1453_v37 }
 0x2c2   : > { %1196 = vst [vmem:[%s1809_s29 + $0x70] sm:$0xff] %v1180_v54  ;;  %v1181_v21 = vadd.f32 %v1455_v30, %v1052_v38 }
 0x2c4   : > { %1197 = vst [vmem:[%s1809_s29 + $0x78] sm:$0xff] %v1181_v21 }
 0x2c5   : > { %1610 = shalt.err (!%p1607_p7)
}
 0x2c6   : > { %s1611_s6 = scalar_lea.hbm %s2575_s23, 2048  ;;  %s1615_s7 = scalar_lea.hbm %s2639_s4, 4096 }
 0x2c7   : > { %p1612_p8 = scmp.ne.s32.totalorder %s2575_s23, %s1611_s6  ;;  %p1616_p12 = scmp.lt.u32.totalorder %s2575_s23, %s2639_s4 }
 0x2c8   : > { %p1617_p13 = scmp.lt.u32.totalorder %s1615_s7, %s1611_s6  ;;  %p1619_p1 = scmp.lt.u32.totalorder %s1611_s6, %s2575_s23 }
 0x2c9   : > { %p1613_p10 = pnand %p1612_p8, %p1774_p3 }
 0x2ca   : > { %p1618_p0 = por %p1617_p13, %p1616_p12 }
 0x2cb   : > { %p1614_p11 = pneg %p1613_p10 }
 0x2cc   : > { %p1620_p2 = por %p1619_p1, %p1618_p0 }
 0x2ce   : > { %p1621_p4 = pnand %p1620_p2, %p1614_p11 }
 0x2d0   : > { %1624 = shalt.err (!%p1621_p4)
}
 0x2d1   : > { %s1698_s12 = smov 128   ;;  %s1699_s14 = smov 8  }
 0x2d2   : > { %1504 = dma.vmem_to_hbm [thread:$0]  (%p1774_p3), %s2577_s11, 2048, %s2575_s23, %s2583_s19, %s1698_s12, %s1698_s12, %s1699_s14  }
 0x2d3 PF: > { %p1510_p5 = scmp.ge.s32.totalorder %s1691_s22, 2  ;;  %s1227_s24 = sand.u32 1, %s1663_s15  }
 0x2d4   : > { %s1228_s18 = scalar_lea.sflag [#allocation3], %s1227_s24 }
 0x2d5   : > { %p1507_p6 = pnand %p1510_p5, %p1784_p9 }
 0x2d7   : > { %1658 = dma.done.wait (!%p1507_p6), %s1228_s18, 2048  }
 0x2d8   : > { %1660 = vsyncadd (!%p1507_p6), %s1228_s18, 4294965248  ;;  %s17_s22 = sadd.s32 1, %s1691_s22   ;;  %s2724_s15 = smov %s1667_s16 }
 0x2d9   : > { %p14_p7 = scmp.ge.s32.totalorder %s17_s22, 18   ;;  %s2725_s16 = smov %s1671_s17 }
 0x2da   : > { %s2726_s17 = smov %s1792_s5  ;;  %s2727_s18 = smov %s1683_s20 }
 0x2db   : > { %s2728_s19 = smov %s1687_s21  ;;  %s2729_s20 = smov %s2732_s25 }
 0x2dc   : > { %s2730_s21 = smov %s2736_s26  ;;  %16 = sbr.rel (!%p14_p7) target bundleno = 5 (0x5), region = 78 }
 0x2e3   :  { %1233 = vsyncpa [#allocation3], 1 }
 0x2e4   :  { %1235 = vsyncpa [#allocation3 + $0x1], 1 }

</bundles_post_ra>
